<compile_context>
chip_gen: v7x
topology: tpu7x:2x2x1
jax: 0.10.0
libtpu: 0.0.40
codegen_flags: <defaults>
</compile_context>

<pallas_src>
import jax
import jax.numpy as jnp
import numpy as np
from jax.experimental import pallas as pl
from jax.experimental.pallas import tpu as pltpu

# ---------------- problem sizes (small, consistent with the module) ----------
B = 2            # batch
C_IN = 4         # input channels
H = W = 16       # spatial
C_OUT = 64       # synthetic backbone feature dim (stands in for 2048)
FOCAL = 16       # stands in for focal_shape=300
HIDDEN = 32      # stands in for fc1 out_features=512
KH = KW = 3      # conv kernel

K_REAL = KH * KW * C_IN      # 36  (im2col contraction size)
KPAD = 128                   # padded contraction dim; ones col at K_REAL -> bc
CPAD = 128                   # padded conv output channels (cols >= C_OUT are 0)
FPAD = 128                   # padded focal dim; ones col at FOCAL -> b1
HW = H * W


def calib_kernel(xp_ref, wc_ref, focal_ref, w1_ref, w2b_ref, o_ref):
    """Fused: conv (one im2col matmul, bias folded) + ReLU + global avgpool +
    [features | focal] fc1 (split matmul, bias folded) + ReLU + fc2."""
    # conv as a single (B*HW, KPAD) @ (KPAD, CPAD) MXU pass; bc folded via the
    # ones column in xp.  Padded rows/cols are zero -> no effect.
    conv = jnp.maximum(
        jnp.dot(xp_ref[...], wc_ref[...], preferred_element_type=jnp.float32),
        0.0)                                               # (B*HW, CPAD)

    # global average pool over spatial positions -> (B, CPAD) features.
    feats = conv.reshape(B, HW, CPAD).sum(axis=1) * (1.0 / HW)

    # fc1: concat([feats, focal]) expressed as a split matmul against the two
    # halves of the packed fc1 weight; b1 folded via the focal ones column.
    hid = (jnp.dot(feats, w1_ref[:CPAD, :], preferred_element_type=jnp.float32)
           + jnp.dot(focal_ref[...], w1_ref[CPAD:, :],
                     preferred_element_type=jnp.float32))
    hid = jnp.maximum(hid, 0.0)                            # (B, HIDDEN)

    # fc2; bias packed as the last row of w2b.
    o_ref[...] = (jnp.dot(hid, w2b_ref[:HIDDEN, :],
                          preferred_element_type=jnp.float32)
                  + w2b_ref[HIDDEN:HIDDEN + 1, :])


def calib_forward(x_nchw, focal, params):
    """x_nchw: (B, C, H, W) float32; focal: (B, FOCAL) float32."""
    wc, bc, w1, b1, w2, b2 = params

    # NCHW -> NHWC, zero-pad spatial by 1 (3x3 "same" conv).
    x = jnp.transpose(x_nchw, (0, 2, 3, 1))
    x = jnp.pad(x, ((0, 0), (1, 1), (1, 1), (0, 0)))

    # --- im2col at the wrapper boundary: (B*HW, K_REAL), lane-padded to KPAD,
    #     with a ones column at K_REAL that carries the conv bias. ---
    patches = jnp.concatenate(
        [x[:, kh:kh + H, kw:kw + W, :] for kh in range(KH) for kw in range(KW)],
        axis=-1).reshape(B * HW, K_REAL)
    xp = jnp.zeros((B * HW, KPAD), jnp.float32)
    xp = xp.at[:, :K_REAL].set(patches)
    xp = xp.at[:, K_REAL].set(1.0)

    # --- conv weight (KH,KW,Cin,Cout) -> (K_REAL, C_OUT), padded, bc folded. --
    wconv_p = jnp.zeros((KPAD, CPAD), jnp.float32)
    wconv_p = wconv_p.at[:K_REAL, :C_OUT].set(wc.reshape(K_REAL, C_OUT))
    wconv_p = wconv_p.at[K_REAL, :C_OUT].set(bc)

    # --- focal padded to FPAD with a ones column at FOCAL (carries b1). ---
    focal_p = jnp.zeros((B, FPAD), jnp.float32)
    focal_p = focal_p.at[:, :FOCAL].set(focal)
    focal_p = focal_p.at[:, FOCAL].set(1.0)

    # --- fc1 packed: rows [0,CPAD) = feature half, rows [CPAD,CPAD+FPAD) =
    #     focal half with b1 in the ones row. ---
    w1_packed = jnp.zeros((CPAD + FPAD, HIDDEN), jnp.float32)
    w1_packed = w1_packed.at[:C_OUT, :].set(w1[:C_OUT])
    w1_packed = w1_packed.at[CPAD:CPAD + FOCAL, :].set(w1[C_OUT:])
    w1_packed = w1_packed.at[CPAD + FOCAL, :].set(b1)

    # --- fc2 weight + bias packed into one (HIDDEN+1, 1) array. ---
    w2b = jnp.concatenate([w2, b2.reshape(1, 1)], axis=0)

    vmem = pl.BlockSpec(memory_space=pltpu.MemorySpace.VMEM)
    return pl.pallas_call(
        calib_kernel,
        out_shape=jax.ShapeDtypeStruct((B, 1), jnp.float32),
        in_specs=[vmem] * 5,
        out_specs=vmem,
    )(xp, wconv_p, focal_p, w1_packed, w2b)


def calib_reference(x_nchw, focal, params):
    """Pure-JAX reference for correctness checking."""
    wc, bc, w1, b1, w2, b2 = params
    x = jnp.transpose(x_nchw, (0, 2, 3, 1))
    x = jnp.pad(x, ((0, 0), (1, 1), (1, 1), (0, 0)))
    acc = jnp.zeros((B, H, W, C_OUT), jnp.float32)
    for kh in range(KH):
        for kw in range(KW):
            acc += jnp.einsum("bhwc,cd->bhwd",
                              x[:, kh:kh + H, kw:kw + W, :], wc[kh, kw])
    acc = jnp.maximum(acc + bc, 0.0)
    feats = acc.mean(axis=(1, 2))
    cat = jnp.concatenate([feats, focal], axis=1)
    hid = jnp.maximum(cat @ w1 + b1, 0.0)
    return hid @ w2 + b2


def init_params(key):
    ks = jax.random.split(key, 6)
    wc = jax.random.normal(ks[0], (KH, KW, C_IN, C_OUT), jnp.float32) * 0.1
    bc = jax.random.normal(ks[1], (C_OUT,), jnp.float32) * 0.01
    w1 = jax.random.normal(ks[2], (C_OUT + FOCAL, HIDDEN), jnp.float32) * 0.05
    b1 = jax.random.normal(ks[3], (HIDDEN,), jnp.float32) * 0.01
    w2 = jax.random.normal(ks[4], (HIDDEN, 1), jnp.float32) * 0.05
    b2 = jax.random.normal(ks[5], (1,), jnp.float32) * 0.01
    return wc, bc, w1, b1, w2, b2


if __name__ == "__main__":
    key = jax.random.PRNGKey(0)
    kx, kf, kp = jax.random.split(key, 3)
    x = jax.random.normal(kx, (B, C_IN, H, W), jnp.float32)       # NCHW input
    focal = jax.random.normal(kf, (B, FOCAL), jnp.float32)
    params = init_params(kp)

    out = jax.block_until_ready(calib_forward(x, focal, params))
    ref = jax.block_until_ready(calib_reference(x, focal, params))

    assert out.shape == (B, 1)
    np.testing.assert_allclose(np.asarray(out), np.asarray(ref),
                               rtol=1e-4, atol=1e-4)
    print("KERNEL_OK")
</pallas_src>

<mosaic_0001>
module attributes {stable_mosaic.version = 11 : i64} {
  func.func @calib_kernel(%arg0: memref<512x128xf32, #tpu.memory_space<vmem>>, %arg1: memref<128x128xf32, #tpu.memory_space<vmem>>, %arg2: memref<2x128xf32, #tpu.memory_space<vmem>>, %arg3: memref<256x32xf32, #tpu.memory_space<vmem>>, %arg4: memref<33x1xf32, #tpu.memory_space<vmem>>, %arg5: memref<2x1xf32, #tpu.memory_space<vmem>>) attributes {dimension_semantics = [], scalar_prefetch = 0 : i64, scratch_operands = 0 : i64, tpu.core_type = #tpu.core_type<tc>} {
    %c0 = arith.constant 0 : index
    %c0_0 = arith.constant 0 : index
    %0 = vector.load %arg0[%c0, %c0_0] : memref<512x128xf32, #tpu.memory_space<vmem>>, vector<512x128xf32>
    %c0_1 = arith.constant 0 : index
    %c0_2 = arith.constant 0 : index
    %1 = vector.load %arg1[%c0_1, %c0_2] : memref<128x128xf32, #tpu.memory_space<vmem>>, vector<128x128xf32>
    %cst = arith.constant dense<0.000000e+00> : vector<512x128xf32>
    %2 = tpu.matmul %0, %1, %cst {dimension_numbers = #tpu.dot_dimension_numbers<[1], [0], [0], [1], [0, 0, 1, 1], [], []>} : vector<512x128xf32>, vector<128x128xf32>, vector<512x128xf32> -> vector<512x128xf32>
    %cst_3 = arith.constant 0.000000e+00 : f32
    %3 = vector.broadcast %cst_3 : f32 to vector<512x128xf32>
    %4 = arith.maximumf %2, %3 : vector<512x128xf32>
    %5 = vector.shape_cast %4 : vector<512x128xf32> to vector<2x256x128xf32>
    %cst_4 = arith.constant dense<0.000000e+00> : vector<2x128xf32>
    %6 = vector.multi_reduction <add>, %5, %cst_4 [1] : vector<2x256x128xf32> to vector<2x128xf32>
    %cst_5 = arith.constant 3.906250e-03 : f32
    %7 = vector.broadcast %cst_5 : f32 to vector<2x128xf32>
    %8 = arith.mulf %6, %7 : vector<2x128xf32>
    %c0_6 = arith.constant 0 : index
    %c0_7 = arith.constant 0 : index
    %9 = vector.load %arg3[%c0_6, %c0_7] : memref<256x32xf32, #tpu.memory_space<vmem>>, vector<128x32xf32>
    %cst_8 = arith.constant dense<0.000000e+00> : vector<2x32xf32>
    %10 = tpu.matmul %8, %9, %cst_8 {dimension_numbers = #tpu.dot_dimension_numbers<[1], [0], [0], [1], [0, 0, 1, 1], [], []>} : vector<2x128xf32>, vector<128x32xf32>, vector<2x32xf32> -> vector<2x32xf32>
    %c0_9 = arith.constant 0 : index
    %c0_10 = arith.constant 0 : index
    %11 = vector.load %arg2[%c0_9, %c0_10] : memref<2x128xf32, #tpu.memory_space<vmem>>, vector<2x128xf32>
    %c128 = arith.constant 128 : index
    %c0_11 = arith.constant 0 : index
    %12 = vector.load %arg3[%c128, %c0_11] : memref<256x32xf32, #tpu.memory_space<vmem>>, vector<128x32xf32>
    %cst_12 = arith.constant dense<0.000000e+00> : vector<2x32xf32>
    %13 = tpu.matmul %11, %12, %cst_12 {dimension_numbers = #tpu.dot_dimension_numbers<[1], [0], [0], [1], [0, 0, 1, 1], [], []>} : vector<2x128xf32>, vector<128x32xf32>, vector<2x32xf32> -> vector<2x32xf32>
    %14 = arith.addf %10, %13 : vector<2x32xf32>
    %cst_13 = arith.constant 0.000000e+00 : f32
    %15 = vector.broadcast %cst_13 : f32 to vector<2x32xf32>
    %16 = arith.maximumf %14, %15 : vector<2x32xf32>
    %c0_14 = arith.constant 0 : index
    %c0_15 = arith.constant 0 : index
    %17 = vector.load %arg4[%c0_14, %c0_15] : memref<33x1xf32, #tpu.memory_space<vmem>>, vector<32x1xf32>
    %cst_16 = arith.constant dense<0.000000e+00> : vector<2x1xf32>
    %18 = tpu.matmul %16, %17, %cst_16 {dimension_numbers = #tpu.dot_dimension_numbers<[1], [0], [0], [1], [0, 0, 1, 1], [], []>} : vector<2x32xf32>, vector<32x1xf32>, vector<2x1xf32> -> vector<2x1xf32>
    %c32 = arith.constant 32 : index
    %c0_17 = arith.constant 0 : index
    %19 = vector.load %arg4[%c32, %c0_17] : memref<33x1xf32, #tpu.memory_space<vmem>>, vector<1x1xf32>
    %20 = vector.broadcast %19 : vector<1x1xf32> to vector<2x1xf32>
    %21 = arith.addf %18, %20 : vector<2x1xf32>
    %c0_18 = arith.constant 0 : index
    %c0_19 = arith.constant 0 : index
    %22 = vector.load %arg5[%c0_18, %c0_19] : memref<2x1xf32, #tpu.memory_space<vmem>>, vector<2x1xf32>
    tpu.vector_store %arg5[%c0_18, %c0_19], %21 {strides = array<i32>} : memref<2x1xf32, #tpu.memory_space<vmem>>, vector<2x1xf32>,
    return
  }
}

</mosaic_0001>

<bundles_post_ra>
// kernel: tpu_custom_call.1
= control target key start
LH: loop header
LB: loop body
LE: loop exit
PB: predicated region body
PF: predicated region fallthrough
CT: control target
= control target key end

     0   :  { %10 = vsyncpa [#allocation3], 0  ;;  %s1372_s18 = smov [#allocation2]   ;;  %s1673_s0 = inlined_call_operand.hbm [shape: f32[512,128], index: 0, kind: input, shape index: {}]   ;;  %s1674_s1 = inlined_call_operand.vmem [shape: f32[128,128], index: 1, kind: input, shape index: {}]   ;;  %s1675_s2 = inlined_call_operand.vmem [shape: f32[2,128], index: 2, kind: input, shape index: {}]   ;;  %s1676_s3 = inlined_call_operand.vmem [shape: f32[256,32], index: 3, kind: input, shape index: {}]   ;;  %s1677_s4 = inlined_call_operand.vmem [shape: f32[33,1], index: 4, kind: input, shape index: {}]   ;;  %s1678_s5 = inlined_call_operand.vmem [shape: f32[2,1], index: 5, kind: output, shape index: {}]  }
   0x1   :  { %s16_s19 = sshll.u32 %s1372_s18, 4  ;;  %s1348_s22 = scalar_lea.hbm %s1673_s0, 8192  ;;  %s17_s19 = int_to_ptr.vmem [resolvable:$true] %s16_s19 }
   0x2   :  { %p1349_p0 = scmp.ne.s32.totalorder %s1673_s0, %s1348_s22  ;;  %p1352_p1 = scmp.lt.u32.totalorder %s1348_s22, %s1673_s0 }
   0x4   :  { %p1354_p2 = pnand %p1352_p1, %p1349_p0 }
   0x6   :  { %1357 = shalt.err (!%p1354_p2)
}
   0x7   :  { %s1358_s27 = scalar_lea.vmem %s17_s19, 8192  ;;  %p1363_p4 = scmp.lt.s32.totalorder %s17_s19, %s17_s19 }
   0x8   :  { %p1359_p3 = scmp.ne.s32.totalorder %s17_s19, %s1358_s27  ;;  %p1364_p5 = scmp.lt.s32.totalorder %s1358_s27, %s1358_s27 }
   0xa   :  { %p1365_p6 = por %p1364_p5, %p1363_p4 }
   0xc   :  { %p1366_p7 = pnand %p1365_p6, %p1359_p3 }
   0xe   :  { %1369 = shalt.err (!%p1366_p7)
}
   0xf   :  { %s1373_s28 = smov 128   ;;  %s1374_s29 = smov 8  }
  0x10   :  { %22 = dma.hbm_to_vmem [thread:$0]  %s1673_s0, 8192, %s17_s19, [#allocation3], %s1373_s28, %s1373_s28, %s1374_s29  }
  0x11   :  { %1370 = dma.done.wait [#allocation3], 8192  }
  0x12   :  { %1371 = vsyncadd [#allocation3], 4294959104  ;;  %v98_v0 = vld [vmem:[%s1674_s1] sm:$0xff]  ;;  %v99_v1 = vld [vmem:[%s1674_s1 + $0x8] sm:$0xff]  ;;  %vm1376_vm0 = vmmov 0   ;;  %vm744_vm1 = vcmask 1041409  }
  0x13   :  { %v100_v2 = vld [vmem:[%s1674_s1 + $0x10] sm:$0xff]  ;;  %v1238_v3 = vpack.c.bf16 %v99_v1, %v98_v0  ;;  %v101_v4 = vld [vmem:[%s1674_s1 + $0x18] sm:$0xff]  ;;  %v102_v6 = vld [vmem:[%s1674_s1 + $0x20] sm:$0xff]  ;;  %vm827_vm2 = vcmask 261120   ;;  %vm901_vm3 = vcmask 1024  }
  0x14   :  { %v1242_v5 = vpack.c.bf16 %v101_v4, %v100_v2  ;;  %v103_v7 = vld [vmem:[%s1674_s1 + $0x28] sm:$0xff]  ;;  %v34_v9 = vld [vmem:[#allocation2] sm:$0xff]  ;;  %v104_v10 = vld [vmem:[%s1674_s1 + $0x30] sm:$0xff] }
  0x15   :  { %1239 = vmatprep.subr.bf16.mxu0 %v1238_v3  ;;  %1324 = vmatprep.subr.bf16.mxu1 %v1238_v3  ;;  %v1246_v8 = vpack.c.bf16 %v103_v7, %v102_v6  ;;  %v105_v11 = vld [vmem:[%s1674_s1 + $0x38] sm:$0xff]  ;;  %v106_v13 = vld [vmem:[%s1674_s1 + $0x40] sm:$0xff]  ;;  %v107_v14 = vld [vmem:[%s1674_s1 + $0x48] sm:$0xff] }
  0x16   :  { %1241 = vmatpush3.bf16.msra.mxu0 %v1238_v3  ;;  %1332 = vmatpush3.bf16.msra.mxu1 %v1238_v3  ;;  %v1250_v12 = vpack.c.bf16 %v105_v11, %v104_v10  ;;  %v1254_v15 = vpack.c.bf16 %v107_v14, %v106_v13  ;;  %v108_v16 = vld [vmem:[%s1674_s1 + $0x50] sm:$0xff]  ;;  %v109_v17 = vld [vmem:[%s1674_s1 + $0x58] sm:$0xff]  ;;  %v110_v19 = vld [vmem:[%s1674_s1 + $0x60] sm:$0xff] }
  0x17   :  { %1243 = vmatprep.subr.bf16.mxu0 %v1242_v5  ;;  %1325 = vmatprep.subr.bf16.mxu1 %v1242_v5  ;;  %v1258_v18 = vpack.c.bf16 %v109_v17, %v108_v16  ;;  %v111_v20 = vld [vmem:[%s1674_s1 + $0x68] sm:$0xff]  ;;  %v78_v21 = vld [vmem:[#allocation2 + $0x160] sm:$0xff]  ;;  %v112_v23 = vld [vmem:[%s1674_s1 + $0x70] sm:$0xff] }
  0x18   :  { %1061 = vmatprep.mubr.f32.mxu0 %v34_v9  ;;  %v1262_v22 = vpack.c.bf16 %v111_v20, %v110_v19  ;;  %v113_v24 = vld [vmem:[%s1674_s1 + $0x78] sm:$0xff]  ;;  %1127 = vmatprep.mubr.f32.mxu1 %v78_v21  ;;  %v35_v26 = vld [vmem:[#allocation2 + $0x8] sm:$0xff]  ;;  %v36_v28 = vld [vmem:[#allocation2 + $0x10] sm:$0xff] }
  0x19   :  { %v1266_v25 = vpack.c.bf16 %v113_v24, %v112_v23  ;;  %v79_v27 = vld [vmem:[#allocation2 + $0x168] sm:$0xff]  ;;  %v80_v29 = vld [vmem:[#allocation2 + $0x170] sm:$0xff]  ;;  %v37_v30 = vld [vmem:[#allocation2 + $0x18] sm:$0xff]  ;;  %v1375_v24 = vmov 0.0|0.0  }
  0x1a   :  { %1245 = vmatpush3.bf16.msra.mxu0 %v1242_v5  ;;  %1333 = vmatpush3.bf16.msra.mxu1 %v1242_v5  ;;  %v81_v31 = vld [vmem:[#allocation2 + $0x178] sm:$0xff]  ;;  %v38_v32 = vld [vmem:[#allocation2 + $0x20] sm:$0xff]  ;;  %v39_v34 = vld [vmem:[#allocation2 + $0x28] sm:$0xff] }
  0x1b   :  { %1247 = vmatprep.subr.bf16.mxu0 %v1246_v8  ;;  %1326 = vmatprep.subr.bf16.mxu1 %v1246_v8  ;;  %v82_v33 = vld [vmem:[#allocation2 + $0x180] sm:$0xff]  ;;  %v83_v35 = vld [vmem:[#allocation2 + $0x188] sm:$0xff]  ;;  %v40_v36 = vld [vmem:[#allocation2 + $0x30] sm:$0xff] }
  0x1c   :  { %v84_v37 = vld [vmem:[#allocation2 + $0x190] sm:$0xff]  ;;  %v41_v38 = vld [vmem:[#allocation2 + $0x38] sm:$0xff]  ;;  %v42_v40 = vld [vmem:[#allocation2 + $0x40] sm:$0xff] }
  0x1d   :  { %v85_v39 = vld [vmem:[#allocation2 + $0x198] sm:$0xff]  ;;  %v86_v41 = vld [vmem:[#allocation2 + $0x1a0] sm:$0xff]  ;;  %v43_v42 = vld [vmem:[#allocation2 + $0x48] sm:$0xff] }
  0x1e   :  { %1249 = vmatpush3.bf16.msra.mxu0 %v1246_v8  ;;  %1334 = vmatpush3.bf16.msra.mxu1 %v1246_v8  ;;  %v87_v43 = vld [vmem:[#allocation2 + $0x1a8] sm:$0xff]  ;;  %v44_v44 = vld [vmem:[#allocation2 + $0x50] sm:$0xff]  ;;  %v45_v46 = vld [vmem:[#allocation2 + $0x58] sm:$0xff] }
  0x1f   :  { %1251 = vmatprep.subr.bf16.mxu0 %v1250_v12  ;;  %1327 = vmatprep.subr.bf16.mxu1 %v1250_v12  ;;  %v88_v45 = vld [vmem:[#allocation2 + $0x1b0] sm:$0xff]  ;;  %v89_v47 = vld [vmem:[#allocation2 + $0x1b8] sm:$0xff]  ;;  %v46_v48 = vld [vmem:[#allocation2 + $0x60] sm:$0xff] }
  0x20   :  { %v90_v49 = vld [vmem:[#allocation2 + $0x1c0] sm:$0xff]  ;;  %v47_v50 = vld [vmem:[#allocation2 + $0x68] sm:$0xff]  ;;  %v48_v52 = vld [vmem:[#allocation2 + $0x70] sm:$0xff] }
  0x21   :  { %v91_v51 = vld [vmem:[#allocation2 + $0x1c8] sm:$0xff]  ;;  %v92_v53 = vld [vmem:[#allocation2 + $0x1d0] sm:$0xff]  ;;  %v49_v54 = vld [vmem:[#allocation2 + $0x78] sm:$0xff] }
  0x22   :  { %1253 = vmatpush3.bf16.msra.mxu0 %v1250_v12  ;;  %1335 = vmatpush3.bf16.msra.mxu1 %v1250_v12  ;;  %v93_v55 = vld [vmem:[#allocation2 + $0x1d8] sm:$0xff]  ;;  %v50_v56 = vld [vmem:[#allocation2 + $0x80] sm:$0xff]  ;;  %v51_v58 = vld [vmem:[#allocation2 + $0x88] sm:$0xff] }
  0x23   :  { %1255 = vmatprep.subr.bf16.mxu0 %v1254_v15  ;;  %1328 = vmatprep.subr.bf16.mxu1 %v1254_v15  ;;  %v94_v57 = vld [vmem:[#allocation2 + $0x1e0] sm:$0xff]  ;;  %v95_v59 = vld [vmem:[#allocation2 + $0x1e8] sm:$0xff]  ;;  %v52_v60 = vld [vmem:[#allocation2 + $0x90] sm:$0xff] }
  0x24   :  { %v96_v61 = vld [vmem:[#allocation2 + $0x1f0] sm:$0xff]  ;;  %v53_v62 = vld [vmem:[#allocation2 + $0x98] sm:$0xff]  ;;  %v54_v0 = vld [vmem:[#allocation2 + $0xa0] sm:$0xff] }
  0x25   :  { %v97_v63 = vld [vmem:[#allocation2 + $0x1f8] sm:$0xff]  ;;  %v55_v1 = vld [vmem:[#allocation2 + $0xa8] sm:$0xff]  ;;  %v56_v2 = vld [vmem:[#allocation2 + $0xb0] sm:$0xff] }
  0x26   :  { %1257 = vmatpush3.bf16.msra.mxu0 %v1254_v15  ;;  %1336 = vmatpush3.bf16.msra.mxu1 %v1254_v15  ;;  %v57_v3 = vld [vmem:[#allocation2 + $0xb8] sm:$0xff]  ;;  %v58_v4 = vld [vmem:[#allocation2 + $0xc0] sm:$0xff]  ;;  %v59_v5 = vld [vmem:[#allocation2 + $0xc8] sm:$0xff] }
  0x27   :  { %1259 = vmatprep.subr.bf16.mxu0 %v1258_v18  ;;  %1329 = vmatprep.subr.bf16.mxu1 %v1258_v18  ;;  %v60_v6 = vld [vmem:[#allocation2 + $0xd0] sm:$0xff]  ;;  %v61_v7 = vld [vmem:[#allocation2 + $0xd8] sm:$0xff]  ;;  %v62_v8 = vld [vmem:[#allocation2 + $0xe0] sm:$0xff] }
  0x28   :  { %v63_v9 = vld [vmem:[#allocation2 + $0xe8] sm:$0xff]  ;;  %v64_v10 = vld [vmem:[#allocation2 + $0xf0] sm:$0xff]  ;;  %v65_v11 = vld [vmem:[#allocation2 + $0xf8] sm:$0xff] }
  0x29   :  { %v66_v12 = vld [vmem:[#allocation2 + $0x100] sm:$0xff]  ;;  %v67_v13 = vld [vmem:[#allocation2 + $0x108] sm:$0xff]  ;;  %v68_v14 = vld [vmem:[#allocation2 + $0x110] sm:$0xff] }
  0x2a   :  { %1261 = vmatpush3.bf16.msra.mxu0 %v1258_v18  ;;  %1337 = vmatpush3.bf16.msra.mxu1 %v1258_v18  ;;  %v69_v15 = vld [vmem:[#allocation2 + $0x118] sm:$0xff]  ;;  %v70_v16 = vld [vmem:[#allocation2 + $0x120] sm:$0xff]  ;;  %v71_v17 = vld [vmem:[#allocation2 + $0x128] sm:$0xff] }
  0x2b   :  { %1263 = vmatprep.subr.bf16.mxu0 %v1262_v22  ;;  %1330 = vmatprep.subr.bf16.mxu1 %v1262_v22  ;;  %v72_v18 = vld [vmem:[#allocation2 + $0x130] sm:$0xff]  ;;  %v73_v19 = vld [vmem:[#allocation2 + $0x138] sm:$0xff]  ;;  %v74_v20 = vld [vmem:[#allocation2 + $0x140] sm:$0xff] }
  0x2c   :  { %v75_v21 = vld [vmem:[#allocation2 + $0x148] sm:$0xff]  ;;  %v77_v23 = vld [vmem:[#allocation2 + $0x158] sm:$0xff] }
  0x2e   :  { %1265 = vmatpush3.bf16.msra.mxu0 %v1262_v22  ;;  %1338 = vmatpush3.bf16.msra.mxu1 %v1262_v22  ;;  %v76_v22 = vld [vmem:[#allocation2 + $0x150] sm:$0xff] }
  0x2f   :  { %1267 = vmatprep.subr.bf16.mxu0 %v1266_v25  ;;  %1331 = vmatprep.subr.bf16.mxu1 %v1266_v25 }
  0x32   :  { %1269 = vmatpush3.bf16.msra.mxu0 %v1266_v25  ;;  %1339 = vmatpush3.bf16.msra.mxu1 %v1266_v25  ;;  %v656_v25 = vld [vmem:[%s1676_s3 + $0x80] sm:$0xff] }
  0x33   :  { %1270 = vmatprep.subr.bf16.mxu1 %v1375_v24 }
  0x35   :  { %1062 = vmatmul.mubr.f32.vlgmr.msra.gmra.mrb[0].mxu0 %v35_v26  ;;  %1128 = vmatmul.mubr.f32.vlgmr.msra.gmra.mrb[0].mxu1 %v79_v27  ;;  %v657_v26 = vld [vmem:[%s1676_s3 + $0x88] sm:$0xff] }
  0x36   :  { %1064 = vmatprep.mubr.f32.mxu0 %v36_v28  ;;  %1130 = vmatprep.mubr.f32.mxu1 %v80_v29  ;;  %v1271_v27 = vpack.c.bf16 %v657_v26, %v656_v25  ;;  %v658_v28 = vld [vmem:[%s1676_s3 + $0x90] sm:$0xff]  ;;  %v659_v29 = vld [vmem:[%s1676_s3 + $0x98] sm:$0xff]  ;;  %v652_v25 = vld [vmem:[%s1676_s3 + $0x68] sm:$0xff] }
  0x38   :  { %1272 = vmatpush3.bf16.msra.mxu1 %v1271_v27 }
  0x39   :  { %1065 = vmatmul.mubr.f32.gmra.mrb[2].mxu0 %v37_v30  ;;  %1131 = vmatmul.mubr.f32.gmra.mrb[2].mxu1 %v81_v31  ;;  %v1274_v30 = vpack.c.bf16 %v659_v29, %v658_v28  ;;  %v660_v31 = vld [vmem:[%s1676_s3 + $0xa0] sm:$0xff]  ;;  %v653_v29 = vld [vmem:[%s1676_s3 + $0x70] sm:$0xff] }
  0x3a   :  { %1067 = vmatprep.mubr.f32.mxu0 %v38_v32  ;;  %1133 = vmatprep.mubr.f32.mxu1 %v82_v33  ;;  %v661_v32 = vld [vmem:[%s1676_s3 + $0xa8] sm:$0xff] }
  0x3b   :  { %1273 = vmatprep.subr.bf16.mxu1 %v1375_v24  ;;  %v1277_v33 = vpack.c.bf16 %v661_v32, %v660_v31 }
  0x3c   :  { %1275 = vmatpush3.bf16.msra.mxu1 %v1274_v30  ;;  %v654_v30 = vld [vmem:[%s1676_s3 + $0x78] sm:$0xff] }
  0x3d   :  { %1068 = vmatmul.mubr.f32.gmra.mrb[4].mxu0 %v39_v34  ;;  %1134 = vmatmul.mubr.f32.gmra.mrb[4].mxu1 %v83_v35  ;;  %v662_v34 = vld [vmem:[%s1676_s3 + $0xb0] sm:$0xff]  ;;  %v663_v35 = vld [vmem:[%s1676_s3 + $0xb8] sm:$0xff] }
  0x3e   :  { %1070 = vmatprep.mubr.f32.mxu0 %v40_v36  ;;  %1136 = vmatprep.mubr.f32.mxu1 %v84_v37  ;;  %v1280_v36 = vpack.c.bf16 %v663_v35, %v662_v34  ;;  %v664_v37 = vld [vmem:[%s1676_s3 + $0xc0] sm:$0xff] }
  0x3f   :  { %1276 = vmatprep.subr.bf16.mxu1 %v1375_v24 }
  0x40   :  { %1278 = vmatpush3.bf16.msra.mxu1 %v1277_v33 }
  0x41   :  { %1071 = vmatmul.mubr.f32.gmra.mrb[6].mxu0 %v41_v38  ;;  %1137 = vmatmul.mubr.f32.gmra.mrb[6].mxu1 %v85_v39  ;;  %v665_v38 = vld [vmem:[%s1676_s3 + $0xc8] sm:$0xff] }
  0x42   :  { %1073 = vmatprep.mubr.f32.mxu0 %v42_v40  ;;  %1139 = vmatprep.mubr.f32.mxu1 %v86_v41  ;;  %v1283_v39 = vpack.c.bf16 %v665_v38, %v664_v37  ;;  %v666_v40 = vld [vmem:[%s1676_s3 + $0xd0] sm:$0xff]  ;;  %v667_v41 = vld [vmem:[%s1676_s3 + $0xd8] sm:$0xff]  ;;  %v1316_v37 = vpack.c.bf16 %v654_v30, %v653_v29 }
  0x43   :  { %1279 = vmatprep.subr.bf16.mxu1 %v1375_v24 }
  0x44   :  { %1281 = vmatpush3.bf16.msra.mxu1 %v1280_v36 }
  0x45   :  { %1074 = vmatmul.mubr.f32.gmra.mrb[8].mxu0 %v43_v42  ;;  %1140 = vmatmul.mubr.f32.gmra.mrb[8].mxu1 %v87_v43  ;;  %v1286_v42 = vpack.c.bf16 %v667_v41, %v666_v40  ;;  %v668_v43 = vld [vmem:[%s1676_s3 + $0xe0] sm:$0xff] }
  0x46   :  { %1076 = vmatprep.mubr.f32.mxu0 %v44_v44  ;;  %1142 = vmatprep.mubr.f32.mxu1 %v88_v45  ;;  %v669_v44 = vld [vmem:[%s1676_s3 + $0xe8] sm:$0xff] }
  0x47   :  { %1282 = vmatprep.subr.bf16.mxu1 %v1375_v24  ;;  %v1289_v45 = vpack.c.bf16 %v669_v44, %v668_v43 }
  0x48   :  { %1284 = vmatpush3.bf16.msra.mxu1 %v1283_v39 }
  0x49   :  { %1077 = vmatmul.mubr.f32.gmra.mrb[10].mxu0 %v45_v46  ;;  %1143 = vmatmul.mubr.f32.gmra.mrb[10].mxu1 %v89_v47  ;;  %v670_v46 = vld [vmem:[%s1676_s3 + $0xf0] sm:$0xff]  ;;  %v671_v47 = vld [vmem:[%s1676_s3 + $0xf8] sm:$0xff] }
  0x4a   :  { %1079 = vmatprep.mubr.f32.mxu0 %v46_v48  ;;  %1145 = vmatprep.mubr.f32.mxu1 %v90_v49  ;;  %v1292_v48 = vpack.c.bf16 %v671_v47, %v670_v46  ;;  %v639_v49 = vld [vmem:[%s1676_s3] sm:$0xff] }
  0x4b   :  { %1285 = vmatprep.subr.bf16.mxu1 %v1375_v24 }
  0x4c   :  { %1287 = vmatpush3.bf16.msra.mxu1 %v1286_v42 }
  0x4d   :  { %1080 = vmatmul.mubr.f32.gmra.mrb[12].mxu0 %v47_v50  ;;  %1146 = vmatmul.mubr.f32.gmra.mrb[12].mxu1 %v91_v51  ;;  %v640_v50 = vld [vmem:[%s1676_s3 + $0x8] sm:$0xff] }
  0x4e   :  { %1082 = vmatprep.mubr.f32.mxu0 %v48_v52  ;;  %1148 = vmatprep.mubr.f32.mxu1 %v92_v53  ;;  %v1295_v51 = vpack.c.bf16 %v640_v50, %v639_v49  ;;  %v1377_v52 = vmov 0.0   ;;  %v655_v53 = vld [vmem:[%s1675_s2] sm:$0x3] }
  0x4f   :  { %1288 = vmatprep.subr.bf16.mxu1 %v1375_v24 }
  0x50   :  { %1290 = vmatpush3.bf16.msra.mxu1 %v1289_v45 }
  0x51   :  { %1083 = vmatmul.mubr.f32.gmra.mrb[14].mxu0 %v49_v54  ;;  %1149 = vmatmul.mubr.f32.gmra.mrb[14].mxu1 %v93_v55  ;;  %v641_v54 = vld [vmem:[%s1676_s3 + $0x10] sm:$0xff]  ;;  %v642_v55 = vld [vmem:[%s1676_s3 + $0x18] sm:$0xff] }
  0x52   :  { %1085 = vmatprep.mubr.f32.mxu0 %v50_v56  ;;  %1151 = vmatprep.mubr.f32.mxu1 %v94_v57  ;;  %v1298_v56 = vpack.c.bf16 %v642_v55, %v641_v54  ;;  %v643_v57 = vld [vmem:[%s1676_s3 + $0x20] sm:$0xff] }
  0x53   :  { %1291 = vmatprep.subr.bf16.mxu1 %v1375_v24 }
  0x54   :  { %1293 = vmatpush3.bf16.msra.mxu1 %v1292_v48 }
  0x55   :  { %1086 = vmatmul.mubr.f32.gmra.mrb[16].mxu0 %v51_v58  ;;  %1152 = vmatmul.mubr.f32.gmra.mrb[16].mxu1 %v95_v59  ;;  %v644_v58 = vld [vmem:[%s1676_s3 + $0x28] sm:$0xff] }
  0x56   :  { %1088 = vmatprep.mubr.f32.mxu0 %v52_v60  ;;  %1154 = vmatprep.mubr.f32.mxu1 %v96_v61  ;;  %v1301_v59 = vpack.c.bf16 %v644_v58, %v643_v57  ;;  %v645_v60 = vld [vmem:[%s1676_s3 + $0x30] sm:$0xff]  ;;  %v646_v61 = vld [vmem:[%s1676_s3 + $0x38] sm:$0xff] }
  0x57   :  { %1294 = vmatprep.subr.bf16.mxu1 %v1375_v24 }
  0x59   :  { %1089 = vmatmul.mubr.f32.gmra.mrb[18].mxu0 %v53_v62  ;;  %1155 = vmatmul.mubr.f32.gmra.mrb[18].mxu1 %v97_v63  ;;  %v1304_v62 = vpack.c.bf16 %v646_v61, %v645_v60 }
  0x5a   :  { %1091 = vmatprep.mubr.f32.mxu0 %v54_v0  ;;  %1189 = vmatprep.mubr.msk.f32.mxu1 %vm1376_vm0, %v1377_v52 }
  0x5d   :  { %1092 = vmatmul.mubr.f32.gmra.mrb[20].mxu0 %v55_v1  ;;  %1190 = vmatmul.mubr.f32.vlgmr.msra.gmra.mrb[20].mxu1 %v655_v53 }
  0x5e   :  { %1094 = vmatprep.mubr.f32.mxu0 %v56_v2  ;;  %1296 = vmatpush3.bf16.msra.mxu1 %v1295_v51 }
  0x5f   :  { %1224 = vmatprep.mubr.msk.f32.mxu1 %vm1376_vm0, %v1377_v52  ;;  %1297 = vmatprep.subr.bf16.mxu1 %v1375_v24 }
  0x61   :  { %1095 = vmatmul.mubr.f32.gmra.mrb[22].mxu0 %v57_v3 }
  0x62   :  { %1097 = vmatprep.mubr.f32.mxu0 %v58_v4  ;;  %1299 = vmatpush3.bf16.msra.mxu1 %v1298_v56  ;;  %v647_v4 = vld [vmem:[%s1676_s3 + $0x40] sm:$0xff] }
  0x63   :  { %1300 = vmatprep.subr.bf16.mxu1 %v1375_v24 }
  0x65   :  { %1098 = vmatmul.mubr.f32.gmra.mrb[24].mxu0 %v59_v5  ;;  %v648_v5 = vld [vmem:[%s1676_s3 + $0x48] sm:$0xff] }
  0x66   :  { %1100 = vmatprep.mubr.f32.mxu0 %v60_v6  ;;  %1302 = vmatpush3.bf16.msra.mxu1 %v1301_v59 }
  0x67   :  { %1303 = vmatprep.subr.bf16.mxu1 %v1375_v24 }
  0x69   :  { %1101 = vmatmul.mubr.f32.gmra.mrb[26].mxu0 %v61_v7  ;;  %v1307_v7 = vpack.c.bf16 %v648_v5, %v647_v4 }
  0x6a   :  { %1103 = vmatprep.mubr.f32.mxu0 %v62_v8  ;;  %1305 = vmatpush3.bf16.msra.mxu1 %v1304_v62 }
  0x6b   :  { %1306 = vmatprep.subr.bf16.mxu1 %v1375_v24 }
  0x6d   :  { %1104 = vmatmul.mubr.f32.gmra.mrb[28].mxu0 %v63_v9 }
  0x6e   :  { %1106 = vmatprep.mubr.f32.mxu0 %v64_v10  ;;  %1308 = vmatpush3.bf16.msra.mxu1 %v1307_v7 }
  0x6f   :  { %1309 = vmatprep.subr.bf16.mxu1 %v1375_v24 }
  0x71   :  { %1107 = vmatmul.mubr.f32.gmra.mrb[30].mxu0 %v65_v11 }
  0x72   :  { %1109 = vmatprep.mubr.f32.mxu0 %v66_v12 }
  0x75   :  { %1110 = vmatmul.mubr.f32.gmra.mrb[32].mxu0 %v67_v13  ;;  %v649_v13 = vld [vmem:[%s1676_s3 + $0x50] sm:$0xff] }
  0x76   :  { %1112 = vmatprep.mubr.f32.mxu0 %v68_v14  ;;  %v650_v14 = vld [vmem:[%s1676_s3 + $0x58] sm:$0xff] }
  0x79   :  { %1113 = vmatmul.mubr.f32.gmra.mrb[34].mxu0 %v69_v15 }
  0x7a   :  { %1115 = vmatprep.mubr.f32.mxu0 %v70_v16  ;;  %v1310_v16 = vpack.c.bf16 %v650_v14, %v649_v13 }
  0x7c   :  { %1311 = vmatpush3.bf16.msra.mxu1 %v1310_v16 }
  0x7d   :  { %1116 = vmatmul.mubr.f32.gmra.mrb[36].mxu0 %v71_v17  ;;  %1312 = vmatprep.subr.bf16.mxu1 %v1375_v24 }
  0x7e   :  { %1118 = vmatprep.mubr.f32.mxu0 %v72_v18 }
  0x81   :  { %1119 = vmatmul.mubr.f32.gmra.mrb[38].mxu0 %v73_v19 }
  0x82   :  { %1121 = vmatprep.mubr.f32.mxu0 %v74_v20 }
  0x85   :  { %1122 = vmatmul.mubr.f32.gmra.mrb[40].mxu0 %v75_v21 }
  0x86   :  { %1124 = vmatprep.mubr.f32.mxu0 %v76_v22 }
  0x89   :  { %1125 = vmatmul.mubr.f32.gmra.mrb[42].mxu0 %v77_v23  ;;  %v651_v23 = vld [vmem:[%s1676_s3 + $0x60] sm:$0xff] }
  0x8a   :  { %v1313_v28 = vpack.c.bf16 %v652_v25, %v651_v23 }
  0x8c   :  { %1314 = vmatpush3.bf16.msra.mxu1 %v1313_v28 }
  0x8d   :  { %1315 = vmatprep.subr.bf16.mxu1 %v1375_v24 }
  0x90   :  { %1317 = vmatpush3.bf16.msra.mxu1 %v1316_v37 }
  0x91   :  { %1318 = vmatprep.subr.bf16.mxu1 %v1375_v24 }
 0x108   :  { %v1063_v63 = vpop.f32.mrb[0].mxu0  ;;  %v1559_v0 = vpop.f32.mrb[0].mxu1 }
 0x109   :  { %v500_v1 = vmax.f32 %v1063_v63, 0.0  ;;  %v180_v2 = vpop.f32.mrb[1].mxu0  ;;  %v1561_v3 = vpop.f32.mrb[1].mxu1 }
 0x10a   :  { %v499_v6 = vmax.f32 %v180_v2, 0.0 }
 0x10c   :  { %v563_v8 = vadd.f32 %v500_v1, %v499_v6  ;;  %v1066_v9 = vpop.f32.mrb[2].mxu0  ;;  %v1570_v10 = vpop.f32.mrb[2].mxu1 }
 0x10d   :  { %v190_v11 = vpop.f32.mrb[3].mxu0  ;;  %v1572_v12 = vpop.f32.mrb[3].mxu1  ;;  %v502_v17 = vmax.f32 %v1066_v9, 0.0 }
 0x10e   :  { %v501_v15 = vmax.f32 %v190_v11, 0.0 }
 0x110   :  { %v564_v18 = vadd.f32 %v563_v8, %v501_v15  ;;  %v1069_v19 = vpop.f32.mrb[4].mxu0  ;;  %v1581_v20 = vpop.f32.mrb[4].mxu1 }
 0x111   :  { %v200_v21 = vpop.f32.mrb[5].mxu0  ;;  %v1583_v22 = vpop.f32.mrb[5].mxu1  ;;  %v504_v31 = vmax.f32 %v1069_v19, 0.0 }
 0x112   :  { %v503_v26 = vmax.f32 %v200_v21, 0.0  ;;  %v565_v27 = vadd.f32 %v564_v18, %v502_v17 }
 0x114   :  { %v566_v32 = vadd.f32 %v565_v27, %v503_v26  ;;  %v1072_v33 = vpop.f32.mrb[6].mxu0  ;;  %v1598_v34 = vpop.f32.mrb[6].mxu1 }
 0x115   :  { %v210_v35 = vpop.f32.mrb[7].mxu0  ;;  %v1600_v36 = vpop.f32.mrb[7].mxu1  ;;  %v506_v40 = vmax.f32 %v1072_v33, 0.0 }
 0x116   :  { %v505_v38 = vmax.f32 %v210_v35, 0.0  ;;  %v567_v39 = vadd.f32 %v566_v32, %v504_v31 }
 0x118   :  { %v568_v41 = vadd.f32 %v567_v39, %v505_v38  ;;  %v1075_v42 = vpop.f32.mrb[8].mxu0  ;;  %v1603_v43 = vpop.f32.mrb[8].mxu1 }
 0x119   :  { %v220_v44 = vpop.f32.mrb[9].mxu0  ;;  %v1605_v45 = vpop.f32.mrb[9].mxu1  ;;  %v508_v48 = vmax.f32 %v1075_v42, 0.0 }
 0x11a   :  { %v507_v46 = vmax.f32 %v220_v44, 0.0  ;;  %v569_v47 = vadd.f32 %v568_v41, %v506_v40 }
 0x11c   :  { %v570_v49 = vadd.f32 %v569_v47, %v507_v46  ;;  %v1078_v50 = vpop.f32.mrb[10].mxu0  ;;  %v1608_v51 = vpop.f32.mrb[10].mxu1 }
 0x11d   :  { %v230_v53 = vpop.f32.mrb[11].mxu0  ;;  %v1610_v54 = vpop.f32.mrb[11].mxu1  ;;  %v510_v57 = vmax.f32 %v1078_v50, 0.0 }
 0x11e   :  { %v509_v55 = vmax.f32 %v230_v53, 0.0  ;;  %v571_v56 = vadd.f32 %v570_v49, %v508_v48 }
 0x120   :  { %v572_v58 = vadd.f32 %v571_v56, %v509_v55  ;;  %v1081_v59 = vpop.f32.mrb[12].mxu0  ;;  %v1612_v60 = vpop.f32.mrb[12].mxu1 }
 0x121   :  { %v240_v61 = vpop.f32.mrb[13].mxu0  ;;  %v1614_v62 = vpop.f32.mrb[13].mxu1  ;;  %v512_v2 = vmax.f32 %v1081_v59, 0.0 }
 0x122   :  { %v511_v63 = vmax.f32 %v240_v61, 0.0  ;;  %v573_v1 = vadd.f32 %v572_v58, %v510_v57 }
 0x124   :  { %v574_v4 = vadd.f32 %v573_v1, %v511_v63  ;;  %v1084_v5 = vpop.f32.mrb[14].mxu0  ;;  %v1616_v6 = vpop.f32.mrb[14].mxu1 }
 0x125   :  { %v250_v7 = vpop.f32.mrb[15].mxu0  ;;  %v1618_v8 = vpop.f32.mrb[15].mxu1  ;;  %v514_v13 = vmax.f32 %v1084_v5, 0.0 }
 0x126   :  { %v513_v9 = vmax.f32 %v250_v7, 0.0  ;;  %v575_v11 = vadd.f32 %v574_v4, %v512_v2 }
 0x128   :  { %v576_v14 = vadd.f32 %v575_v11, %v513_v9  ;;  %v1087_v15 = vpop.f32.mrb[16].mxu0  ;;  %v1620_v16 = vpop.f32.mrb[16].mxu1 }
 0x129   :  { %v260_v17 = vpop.f32.mrb[17].mxu0  ;;  %v1622_v18 = vpop.f32.mrb[17].mxu1  ;;  %v516_v23 = vmax.f32 %v1087_v15, 0.0 }
 0x12a   :  { %v515_v19 = vmax.f32 %v260_v17, 0.0  ;;  %v577_v21 = vadd.f32 %v576_v14, %v514_v13 }
 0x12c   :  { %v578_v25 = vadd.f32 %v577_v21, %v515_v19  ;;  %v1090_v26 = vpop.f32.mrb[18].mxu0  ;;  %v1624_v27 = vpop.f32.mrb[18].mxu1 }
 0x12d   :  { %v270_v28 = vpop.f32.mrb[19].mxu0  ;;  %v1626_v29 = vpop.f32.mrb[19].mxu1  ;;  %v518_v32 = vmax.f32 %v1090_v26, 0.0 }
 0x12e   :  { %v517_v30 = vmax.f32 %v270_v28, 0.0  ;;  %v579_v31 = vadd.f32 %v578_v25, %v516_v23 }
 0x130   :  { %v580_v33 = vadd.f32 %v579_v31, %v517_v30  ;;  %v1093_v35 = vpop.f32.mrb[20].mxu0 }
 0x131   :  { %v280_v37 = vpop.f32.mrb[21].mxu0  ;;  %v520_v40 = vmax.f32 %v1093_v35, 0.0 }
 0x132   :  { %v519_v38 = vmax.f32 %v280_v37, 0.0  ;;  %v581_v39 = vadd.f32 %v580_v33, %v518_v32 }
 0x134   :  { %v582_v41 = vadd.f32 %v581_v39, %v519_v38  ;;  %v1096_v42 = vpop.f32.mrb[22].mxu0 }
 0x135   :  { %v290_v44 = vpop.f32.mrb[23].mxu0  ;;  %v522_v48 = vmax.f32 %v1096_v42, 0.0 }
 0x136   :  { %v521_v46 = vmax.f32 %v290_v44, 0.0  ;;  %v583_v47 = vadd.f32 %v582_v41, %v520_v40 }
 0x138   :  { %v584_v49 = vadd.f32 %v583_v47, %v521_v46  ;;  %v1099_v50 = vpop.f32.mrb[24].mxu0 }
 0x139   :  { %v300_v53 = vpop.f32.mrb[25].mxu0  ;;  %v524_v57 = vmax.f32 %v1099_v50, 0.0 }
 0x13a   :  { %v523_v55 = vmax.f32 %v300_v53, 0.0  ;;  %v585_v56 = vadd.f32 %v584_v49, %v522_v48 }
 0x13c   :  { %v586_v58 = vadd.f32 %v585_v56, %v523_v55  ;;  %v1102_v59 = vpop.f32.mrb[26].mxu0 }
 0x13d   :  { %v310_v61 = vpop.f32.mrb[27].mxu0  ;;  %v526_v2 = vmax.f32 %v1102_v59, 0.0 }
 0x13e   :  { %v525_v63 = vmax.f32 %v310_v61, 0.0  ;;  %v587_v1 = vadd.f32 %v586_v58, %v524_v57 }
 0x140   :  { %v588_v4 = vadd.f32 %v587_v1, %v525_v63  ;;  %v1105_v5 = vpop.f32.mrb[28].mxu0 }
 0x141   :  { %v320_v7 = vpop.f32.mrb[29].mxu0  ;;  %v528_v13 = vmax.f32 %v1105_v5, 0.0 }
 0x142   :  { %v527_v9 = vmax.f32 %v320_v7, 0.0  ;;  %v589_v11 = vadd.f32 %v588_v4, %v526_v2 }
 0x144   :  { %v590_v14 = vadd.f32 %v589_v11, %v527_v9  ;;  %v1108_v15 = vpop.f32.mrb[30].mxu0 }
 0x145   :  { %v330_v17 = vpop.f32.mrb[31].mxu0  ;;  %v530_v23 = vmax.f32 %v1108_v15, 0.0 }
 0x146   :  { %v529_v19 = vmax.f32 %v330_v17, 0.0  ;;  %v591_v21 = vadd.f32 %v590_v14, %v528_v13  ;;  %v543_v14 = vmax.f32 %v1561_v3, 0.0  ;;  %v544_v17 = vmax.f32 %v1559_v0, 0.0 }
 0x147   :  { %v550_v3 = vmax.f32 %v1598_v34, 0.0  ;;  %v551_v0 = vmax.f32 %v1605_v45, 0.0  ;;  %v557_v34 = vmax.f32 %v1618_v8, 0.0  ;;  %v562_v8 = vmax.f32 %v1624_v27, 0.0 }
 0x148   :  { %v592_v25 = vadd.f32 %v591_v21, %v529_v19  ;;  %v1111_v26 = vpop.f32.mrb[32].mxu0  ;;  %v545_v21 = vmax.f32 %v1572_v12, 0.0  ;;  %v552_v12 = vmax.f32 %v1603_v43, 0.0  ;;  %v558_v43 = vmax.f32 %v1616_v6, 0.0 }
 0x149   :  { %v532_v28 = vmax.f32 %v1111_v26, 0.0  ;;  %v340_v30 = vpop.f32.mrb[33].mxu0 }
 0x14a   :  { %v1628_v31 = vadd.f32 %v592_v25, %v530_v23  ;;  %v531_v32 = vmax.f32 %v340_v30, 0.0  ;;  %v546_v25 = vmax.f32 %v1570_v10, 0.0  ;;  %v553_v10 = vmax.f32 %v1610_v54, 0.0 }
 0x14b   :  { %v559_v54 = vmax.f32 %v1622_v18, 0.0 }
 0x14c   :  { %v600_v33 = vadd.f32 %v532_v28, %v531_v32  ;;  %v1114_v35 = vpop.f32.mrb[34].mxu0  ;;  %v547_v28 = vmax.f32 %v1583_v22, 0.0  ;;  %v548_v32 = vmax.f32 %v1581_v20, 0.0  ;;  %v554_v22 = vmax.f32 %v1608_v51, 0.0 }
 0x14d   :  { %v350_v37 = vpop.f32.mrb[35].mxu0  ;;  %v534_v39 = vmax.f32 %v1114_v35, 0.0  ;;  %v549_v35 = vmax.f32 %v1600_v36, 0.0  ;;  %v555_v20 = vmax.f32 %v1614_v62, 0.0  ;;  %v556_v36 = vmax.f32 %v1612_v60, 0.0 }
 0x14e   :  { %v533_v38 = vmax.f32 %v350_v37, 0.0  ;;  %v594_v45 = vrot.slane %v1628_v31, 4 }
 0x150   :  { %v601_v40 = vadd.f32 %v600_v33, %v533_v38  ;;  %v1117_v41 = vpop.f32.mrb[36].mxu0  ;;  %v595_v51 = vadd.f32 %v594_v45, %v1628_v31 }
 0x151   :  { %v360_v42 = vpop.f32.mrb[37].mxu0  ;;  %v536_v47 = vmax.f32 %v1117_v41, 0.0 }
 0x152   :  { %v535_v44 = vmax.f32 %v360_v42, 0.0  ;;  %v602_v46 = vadd.f32 %v601_v40, %v534_v39 }
 0x154   :  { %v603_v48 = vadd.f32 %v602_v46, %v535_v44  ;;  %v1120_v49 = vpop.f32.mrb[38].mxu0 }
 0x155   :  { %v370_v50 = vpop.f32.mrb[39].mxu0  ;;  %v538_v56 = vmax.f32 %v1120_v49, 0.0 }
 0x156   :  { %v537_v53 = vmax.f32 %v370_v50, 0.0  ;;  %v604_v55 = vadd.f32 %v603_v48, %v536_v47  ;;  %v560_v50 = vmax.f32 %v1620_v16, 0.0  ;;  %v818_v16 = vld [vmem:[%s1677_s4] sm:$0xff] }
 0x158   :  { %v605_v57 = vadd.f32 %v604_v55, %v537_v53  ;;  %v1123_v58 = vpop.f32.mrb[40].mxu0  ;;  %v561_v53 = vmax.f32 %v1626_v29, 0.0  ;;  %v596_v55 = vrot.slane %v595_v51, 2  ;;  %v819_v29 = vld [vmem:[%s1677_s4 + $0x8] sm:$0xff] }
 0x159   :  { %v380_v59 = vpop.f32.mrb[41].mxu0  ;;  %v540_v1 = vmax.f32 %v1123_v58, 0.0 }
 0x15a   :  { %v539_v61 = vmax.f32 %v380_v59, 0.0  ;;  %v606_v63 = vadd.f32 %v605_v57, %v538_v56  ;;  %v597_v58 = vadd.f32 %v596_v55, %v595_v51 }
 0x15c   :  { %v607_v2 = vadd.f32 %v606_v63, %v539_v61  ;;  %v1126_v4 = vpop.f32.mrb[42].mxu0  ;;  %v598_v63 = vrot.slane %v597_v58, 1 }
 0x15d   :  { %v390_v5 = vpop.f32.mrb[43].mxu0  ;;  %v542_v11 = vmax.f32 %v1126_v4, 0.0 }
 0x15e   :  { %v541_v7 = vmax.f32 %v390_v5, 0.0  ;;  %v608_v9 = vadd.f32 %v607_v2, %v540_v1  ;;  %v599_v1 = vadd.f32 %v598_v63, %v597_v58  ;;  %v1319_v5 = vpack.c.bf16 %v819_v29, %v818_v16 }
 0x160   :  { %v609_v13 = vadd.f32 %v608_v9, %v541_v7  ;;  %v637_v27 = vmul.f32 0.00390625, %v599_v1  ;;  %v820_v9 = vld [vmem:[%s1677_s4 + $0x10] sm:$0xff] }
 0x162   :  { %v610_v15 = vadd.f32 %v609_v13, %v542_v11  ;;  %v821_v11 = vld [vmem:[%s1677_s4 + $0x18] sm:$0xff] }
 0x163   :  { %v1322_v13 = vpack.c.bf16 %v821_v11, %v820_v9 }
 0x164   :  { %v611_v19 = vadd.f32 %v610_v15, %v543_v14 }
 0x166   :  { %v612_v23 = vadd.f32 %v611_v19, %v544_v17 }
 0x168   :  { %v613_v26 = vadd.f32 %v612_v23, %v545_v21 }
 0x16a   :  { %v614_v30 = vadd.f32 %v613_v26, %v546_v25 }
 0x16c   :  { %v615_v33 = vadd.f32 %v614_v30, %v547_v28 }
 0x16e   :  { %v616_v37 = vadd.f32 %v615_v33, %v548_v32 }
 0x170   :  { %v617_v38 = vadd.f32 %v616_v37, %v549_v35 }
 0x172   :  { %v618_v39 = vadd.f32 %v617_v38, %v550_v3 }
 0x174   :  { %v619_v40 = vadd.f32 %v618_v39, %v551_v0 }
 0x176   :  { %v620_v41 = vadd.f32 %v619_v40, %v552_v12 }
 0x178   :  { %v621_v42 = vadd.f32 %v620_v41, %v553_v10 }
 0x17a   :  { %v622_v44 = vadd.f32 %v621_v42, %v554_v22 }
 0x17c   :  { %v623_v46 = vadd.f32 %v622_v44, %v555_v20 }
 0x17e   :  { %v624_v47 = vadd.f32 %v623_v46, %v556_v36 }
 0x180   :  { %v625_v48 = vadd.f32 %v624_v47, %v557_v34 }
 0x182   :  { %v626_v49 = vadd.f32 %v625_v48, %v558_v43 }
 0x184   :  { %v627_v62 = vadd.f32 %v626_v49, %v559_v54 }
 0x186   :  { %v628_v60 = vadd.f32 %v627_v62, %v560_v50 }
 0x188   :  { %v629_v56 = vadd.f32 %v628_v60, %v561_v53 }
 0x18a   :  { %v630_v57 = vadd.f32 %v629_v56, %v562_v8 }
 0x18c   :  { %v631_v59 = vrot.slane %v630_v57, 4 }
 0x18e   :  { %v632_v6 = vadd.f32 %v631_v59, %v630_v57 }
 0x190   :  { %v633_v61 = vrot.slane %v632_v6, 2 }
 0x192   :  { %v634_v18 = vadd.f32 %v633_v61, %v632_v6 }
 0x194   :  { %v635_v2 = vrot.slane %v634_v18, 1 }
 0x196   :  { %v636_v31 = vadd.f32 %v635_v2, %v634_v18 }
 0x198   :  { %v638_v4 = vmul.f32 0.00390625, %v636_v31 }
 0x19a   :  { %v745_v7 = vsel %vm744_vm1, %v638_v4, %v637_v27 }
 0x19b   :  { %1225 = vmatmul.mubr.f32.vlgmr.msra.gmra.mrb[20].mxu1 %v745_v7 }
 0x19c   :  { %1320 = vmatpush3.bf16.msra.mxu1 %v1319_v5  ;;  %1235 = vmatprep.mubr.msk.f32.mxu1 %vm1376_vm0, %v1377_v52  ;;  %v908_v52 = vld [vmem:[%s1677_s4 + $0x20] ss:$0 sm:$0xff] }
 0x19d   :  { %1321 = vmatprep.subr.bf16.mxu1 %v1375_v24 }
 0x1a0   :  { %1323 = vmatpush3.bf16.msra.mxu1 %v1322_v13 }
 0x26e   :  { %v813_v14 = vpop.f32.mrb[20].mxu1 }
 0x26f   :  { %v817_v15 = vmax.f32 %v813_v14, 0.0  ;;  %v1226_v17 = vpop.f32.mrb[21].mxu1 }
 0x271   :  { %1236 = vmatmul.mubr.msk.f32.vlgmr.msra.gmra.mrb[22].mxu1 %vm827_vm2, %v817_v15 }
 0x344   :  { %v897_v24 = vpop.f32.mrb[22].mxu1 }
 0x345   :  { %v898_v19 = vadd.f32 %v908_v52, %v897_v24  ;;  %v1237_v21 = vpop.f32.mrb[23].mxu1 }
 0x347   :  { %902 = vst.msk [vmem:[%s1678_s5] sm:$0x3] %vm901_vm3, %v898_v19 }
 0x348   :  { %907 = vsyncpa [#allocation3], 1 }

</bundles_post_ra>
